<compile_context>
chip_gen: v6e
topology: v6e:2x2x1
jax: 0.10.0
libtpu: 0.0.40
codegen_flags: <defaults>
</compile_context>

<pallas_src>
import math

import jax
import jax.numpy as jnp
from jax.experimental import pallas as pl
from jax.experimental.pallas import tpu as pltpu  # noqa: F401  (TPU backend import)


def _pos_embed_kernel(row_ref, col_ref, out_ref):
    # row_ref: (H, Dh), col_ref: (W, Dh), out_ref: (H, W, D) with D = 2*Dh
    H, Dh = row_ref.shape
    W = col_ref.shape[0]
    row = row_ref[...]                                         # (H, Dh)
    col = col_ref[...]                                         # (W, Dh)
    row_b = jnp.broadcast_to(row[:, None, :], (H, W, Dh))      # repeat along cols
    col_b = jnp.broadcast_to(col[None, :, :], (H, W, Dh))      # repeat along rows
    # Two direct slice-stores — no lane-axis concatenate / shuffle.
    out_ref[:, :, :Dh] = row_b
    out_ref[:, :, Dh:] = col_b


def learned_2d_positional_embedding(x, row_embed, col_embed):
    """Forward pass of Learned2DPositionalEmbedding.

    x: (B, N, D) — only its shape is used (as in the PyTorch forward).
    row_embed, col_embed: (sqrt(N_max), D // 2) parameters.
    Returns pos_embed of shape (B, N, D) in the parameters' dtype.
    """
    B, N, D = x.shape
    H = W = math.isqrt(N)
    assert H * W == N, "sequence length must be a perfect square"
    Dh = D // 2
    assert 2 * Dh == D, "embed_dim must be even"

    # Only the first H / W rows of the parameters are used (matches [:H], [:W]).
    row_p = row_embed[:H]
    col_p = col_embed[:W]

    # Single-invocation kernel (no grid): one (H, W, D) slab, full-array blocks.
    pos_hwd = pl.pallas_call(
        _pos_embed_kernel,
        out_shape=jax.ShapeDtypeStruct((H, W, D), row_embed.dtype),
        in_specs=[
            pl.BlockSpec((H, Dh), lambda: (0, 0)),
            pl.BlockSpec((W, Dh), lambda: (0, 0)),
        ],
        out_specs=pl.BlockSpec((H, W, D), lambda: (0, 0, 0)),
    )(row_p, col_p)

    # Glue: row-major (H, W, D) -> (N, D) flatten (lane dim untouched, pure
    # metadata), then a broadcast over batch (fuses away inside a larger jit).
    pos = pos_hwd.reshape(N, D)
    return jnp.broadcast_to(pos[None], (B, N, D))


def _reference(x, row_embed, col_embed):
    B, N, D = x.shape
    H = W = math.isqrt(N)
    row = jnp.repeat(row_embed[:H][:, None, :], W, axis=1)   # (H, W, D/2)
    col = jnp.repeat(col_embed[:W][None, :, :], H, axis=0)   # (H, W, D/2)
    pos = jnp.concatenate([row, col], axis=-1).reshape(N, D)
    return jnp.broadcast_to(pos[None], (B, N, D))


if __name__ == "__main__":
    key = jax.random.PRNGKey(0)
    k1, k2, k3 = jax.random.split(key, 3)

    # Small shapes consistent with the module: B=2, num_patches=N=64, embed_dim=32.
    B, N, D = 2, 64, 32
    H = math.isqrt(N)

    x = jax.random.normal(k1, (B, N, D), dtype=jnp.float32)
    row_embed = jax.random.normal(k2, (H, D // 2), dtype=jnp.float32)
    col_embed = jax.random.normal(k3, (H, D // 2), dtype=jnp.float32)

    out = learned_2d_positional_embedding(x, row_embed, col_embed)
    out = jax.block_until_ready(out)

    ref = _reference(x, row_embed, col_embed)
    assert out.shape == (B, N, D)
    assert jnp.allclose(out, ref, atol=1e-6, rtol=1e-6)

    print("KERNEL_OK")
</pallas_src>

<mosaic_0001>
module attributes {stable_mosaic.version = 11 : i64} {
  func.func @_pos_embed_kernel(%arg0: memref<8x16xf32, #tpu.memory_space<vmem>>, %arg1: memref<8x16xf32, #tpu.memory_space<vmem>>, %arg2: memref<8x8x32xf32, #tpu.memory_space<vmem>>) attributes {dimension_semantics = [], scalar_prefetch = 0 : i64, scratch_operands = 0 : i64, tpu.core_type = #tpu.core_type<tc>} {
    %c0 = arith.constant 0 : index
    %c0_0 = arith.constant 0 : index
    %0 = vector.load %arg0[%c0, %c0_0] : memref<8x16xf32, #tpu.memory_space<vmem>>, vector<8x16xf32>
    %c0_1 = arith.constant 0 : index
    %c0_2 = arith.constant 0 : index
    %1 = vector.load %arg1[%c0_1, %c0_2] : memref<8x16xf32, #tpu.memory_space<vmem>>, vector<8x16xf32>
    %2 = vector.shape_cast %0 : vector<8x16xf32> to vector<8x1x16xf32>
    %3 = vector.shape_cast %2 : vector<8x1x16xf32> to vector<8x1x16xf32>
    %4 = vector.broadcast %3 : vector<8x1x16xf32> to vector<8x8x16xf32>
    %5 = vector.shape_cast %1 : vector<8x16xf32> to vector<1x8x16xf32>
    %6 = vector.shape_cast %5 : vector<1x8x16xf32> to vector<1x8x16xf32>
    %7 = vector.broadcast %6 : vector<1x8x16xf32> to vector<8x8x16xf32>
    %c0_3 = arith.constant 0 : index
    %c0_4 = arith.constant 0 : index
    %c0_5 = arith.constant 0 : index
    %8 = vector.load %arg2[%c0_3, %c0_4, %c0_5] : memref<8x8x32xf32, #tpu.memory_space<vmem>>, vector<8x8x16xf32>
    tpu.vector_store %arg2[%c0_3, %c0_4, %c0_5], %4 {strides = array<i32>} : memref<8x8x32xf32, #tpu.memory_space<vmem>>, vector<8x8x16xf32>,
    %c0_6 = arith.constant 0 : index
    %c0_7 = arith.constant 0 : index
    %c16 = arith.constant 16 : index
    %9 = vector.load %arg2[%c0_6, %c0_7, %c16] : memref<8x8x32xf32, #tpu.memory_space<vmem>>, vector<8x8x16xf32>
    tpu.vector_store %arg2[%c0_6, %c0_7, %c16], %7 {strides = array<i32>} : memref<8x8x32xf32, #tpu.memory_space<vmem>>, vector<8x8x16xf32>,
    return
  }
}

</mosaic_0001>

<bundles_post_ra>
// kernel: tpu_custom_call.1
= control target key start
LH: loop header
LB: loop body
LE: loop exit
PB: predicated region body
PF: predicated region fallthrough
CT: control target
= control target key end

     0   :  { %7 = vsyncpa [#allocation3], 0  ;;  %s281_s0 = inlined_call_operand.hbm [shape: f32[8,16], index: 0, kind: input, shape index: {}]   ;;  %s282_s1 = inlined_call_operand.hbm [shape: f32[8,16], index: 1, kind: input, shape index: {}]   ;;  %s283_s2 = inlined_call_operand.hbm [shape: f32[8,8,32], index: 2, kind: output, shape index: {}]  }
   0x1   :  { %8 = vsyncpa [#allocation6], 0 }
   0x2   :  { %9 = vsyncpa [#allocation4], 0  ;;  %s242_s9 = smov [#allocation2]   ;;  %s243_s11 = smov [#allocation5]  }
   0x3   :  { %s16_s10 = sshll.u32 %s242_s9, 4  ;;  %s26_s12 = sshll.u32 %s243_s11, 4  ;;  %s17_s10 = int_to_ptr.vmem [resolvable:$true] %s16_s10  ;;  %s27_s12 = int_to_ptr.vmem [resolvable:$true] %s26_s12 }
   0x4   :  { %s184_s13 = scalar_lea.vmem %s17_s10, 128  ;;  %p189_p1 = scmp.lt.s32.totalorder %s17_s10, %s17_s10 }
   0x5   :  { %p185_p0 = scmp.ne.s32.totalorder %s17_s10, %s184_s13  ;;  %p190_p2 = scmp.lt.s32.totalorder %s184_s13, %s184_s13 }
   0x7   :  { %p191_p3 = por %p190_p2, %p189_p1 }
   0x9   :  { %p192_p4 = pnand %p191_p3, %p185_p0 }
   0xb   :  { %195 = shalt.err (!%p192_p4)
}
   0xc   :  { %19 = dma.hbm_to_vmem [thread:$0]  %s281_s0, 128, %s17_s10, [#allocation3]  }
   0xd   :  { %s204_s16 = scalar_lea.vmem %s27_s12, 128  ;;  %p209_p6 = scmp.lt.s32.totalorder %s27_s12, %s27_s12 }
   0xe   :  { %p205_p5 = scmp.ne.s32.totalorder %s27_s12, %s204_s16  ;;  %p210_p7 = scmp.lt.s32.totalorder %s204_s16, %s204_s16 }
  0x10   :  { %p211_p8 = por %p210_p7, %p209_p6 }
  0x12   :  { %p212_p9 = pnand %p211_p8, %p205_p5 }
  0x14   :  { %215 = shalt.err (!%p212_p9)
}
  0x15   :  { %29 = dma.hbm_to_vmem [thread:$0]  %s282_s1, 128, %s27_s12, [#allocation6]  }
  0x16   :  { %236 = dma.done.wait [#allocation3], 128  }
  0x17   :  { %237 = vsyncadd [#allocation3], 4294967168 }
  0x18   :  { %238 = dma.done.wait [#allocation6], 128  }
  0x19   :  { %239 = vsyncadd [#allocation6], 4294967168  ;;  %v43_v0 = vlaneseq  ;;  %v244_v1 = vmov 1966171168   ;;  %v37_v6 = vld [vmem:[#allocation5] sm:$0xff]  ;;  %v36_v7 = vld [vmem:[#allocation2] sm:$0xff] }
  0x1a   :  { %v41_v2 = vunpack.c.l.s4 %v244_v1  ;;  %s245_s0 = smov 16   ;;  %v39_v8 = vcombine.high %v36_v7, %v36_v7  ;;  %vm128_vm0 = vcmask 130048   ;;  %s246_s1 = smov [#allocation7]   ;;  %vm141_vm1 = vcmask 261248  }
  0x1b   :  { %v44_v3 = vshrl.u32 %v43_v0, 7  ;;  %138 = vrot.lane.b32.xlu0 %v37_v6, %s245_s0  ;;  %s155_s19 = sshll.u32 %s246_s1, 4  ;;  %s156_s19 = int_to_ptr.vmem [resolvable:$true] %s155_s19 }
  0x1c   :  { %v42_v4 = vunpack.c.0.s8 %v41_v2  ;;  %s216_s20 = scalar_lea.vmem %s156_s19, 1024  ;;  %p221_p11 = scmp.lt.s32.totalorder %s156_s19, %s156_s19 }
  0x1d   :  { %v90_v10 = vsub.s32 0, %v44_v3  ;;  %p217_p10 = scmp.ne.s32.totalorder %s156_s19, %s216_s20  ;;  %p222_p12 = scmp.lt.s32.totalorder %s216_s20, %s216_s20 }
  0x1e   :  { %v45_v5 = vsub.s32 %v42_v4, %v44_v3 }
  0x1f   :  { %p223_p13 = por %p222_p12, %p221_p11 }
  0x20   :  { %v46_v9 = vrot.slane %v36_v7, %v45_v5  ;;  %v53_v11 = vrot.slane %v39_v8, %v45_v5 }
  0x21   :  { %p224_p0 = pnand %p223_p13, %p217_p10 }
  0x22   :  { %v54_v12 = vcombine.high %v46_v9, %v46_v9  ;;  %v62_v13 = vrot.slane %v46_v9, %v45_v5  ;;  %v55_v14 = vcombine.high %v53_v11, %v53_v11  ;;  %v69_v15 = vrot.slane %v53_v11, %v45_v5 }
  0x24   :  { %v76_v16 = vrot.slane %v54_v12, %v45_v5  ;;  %v84_v17 = vcombine.high %v62_v13, %v62_v13  ;;  %v91_v18 = vrot.slane %v62_v13, %v90_v10  ;;  %v83_v19 = vrot.slane %v55_v14, %v45_v5 }
  0x25   :  { %v85_v20 = vcombine.high %v69_v15, %v69_v15  ;;  %v107_v24 = vrot.slane %v69_v15, %v90_v10 }
  0x26   :  { %v86_v21 = vcombine.high %v76_v16, %v76_v16  ;;  %v95_v22 = vrot.slane %v76_v16, %v90_v10  ;;  %v99_v23 = vrot.slane %v84_v17, %v90_v10  ;;  %129 = vst.msk [vmem:[#allocation7] sm:$0xff] %vm128_vm0, %v91_v18  ;;  %v87_v25 = vcombine.high %v83_v19, %v83_v19 }
  0x27   :  { %v111_v27 = vrot.slane %v83_v19, %v90_v10  ;;  %v115_v28 = vrot.slane %v85_v20, %v90_v10  ;;  %133 = vst.msk [vmem:[#allocation7 + $0x20] sm:$0xff] %vm128_vm0, %v107_v24 }
  0x28   :  { %v103_v26 = vrot.slane %v86_v21, %v90_v10  ;;  %130 = vst.msk [vmem:[#allocation7 + $0x8] sm:$0xff] %vm128_vm0, %v95_v22  ;;  %131 = vst.msk [vmem:[#allocation7 + $0x10] sm:$0xff] %vm128_vm0, %v99_v23  ;;  %v119_v29 = vrot.slane %v87_v25, %v90_v10 }
  0x29   :  { %134 = vst.msk [vmem:[#allocation7 + $0x28] sm:$0xff] %vm128_vm0, %v111_v27  ;;  %135 = vst.msk [vmem:[#allocation7 + $0x30] sm:$0xff] %vm128_vm0, %v115_v28 }
  0x2a   :  { %132 = vst.msk [vmem:[#allocation7 + $0x18] sm:$0xff] %vm128_vm0, %v103_v26  ;;  %136 = vst.msk [vmem:[#allocation7 + $0x38] sm:$0xff] %vm128_vm0, %v119_v29 }
  0x8d   :  { %v139_v30 = vpop.permute.xlu0 %138 }
  0x8e   :  { %142 = vst.msk [vmem:[#allocation7] sm:$0xff] %vm141_vm1, %v139_v30  ;;  %143 = vst.msk [vmem:[#allocation7 + $0x8] sm:$0xff] %vm141_vm1, %v139_v30 }
  0x8f   :  { %144 = vst.msk [vmem:[#allocation7 + $0x10] sm:$0xff] %vm141_vm1, %v139_v30  ;;  %145 = vst.msk [vmem:[#allocation7 + $0x18] sm:$0xff] %vm141_vm1, %v139_v30 }
  0x90   :  { %146 = vst.msk [vmem:[#allocation7 + $0x20] sm:$0xff] %vm141_vm1, %v139_v30  ;;  %147 = vst.msk [vmem:[#allocation7 + $0x28] sm:$0xff] %vm141_vm1, %v139_v30 }
  0x91   :  { %148 = vst.msk [vmem:[#allocation7 + $0x30] sm:$0xff] %vm141_vm1, %v139_v30  ;;  %149 = vst.msk [vmem:[#allocation7 + $0x38] sm:$0xff] %vm141_vm1, %v139_v30 }
  0x92   :  { %227 = shalt.err (!%p224_p0)
}
  0x93   :  { %s247_s21 = smov 128   ;;  %s248_s22 = smov 8  }
  0x94   :  { %161 = dma.vmem_to_hbm [thread:$0]  %s156_s19, 1024, %s283_s2, [#allocation4], %s247_s21, %s247_s21, %s248_s22  }
  0x95   :  { %240 = dma.done.wait [#allocation4], 1024  }
  0x96   :  { %241 = vsyncadd [#allocation4], 4294966272 }
  0x97   :  { %165 = vsyncpa [#allocation3], 1 }
  0x98   :  { %166 = vsyncpa [#allocation6], 1 }
  0x99   :  { %167 = vsyncpa [#allocation4], 1 }

</bundles_post_ra>
